<compile_context>
chip_gen: v5e
topology: v5e:2x2
jax: 0.10.0
libtpu: 0.0.40
codegen_flags: <defaults>
</compile_context>

<pallas_src>
import functools

import jax
import jax.numpy as jnp
from jax.experimental import pallas as pl
from jax.experimental.pallas import tpu as pltpu

LN_EPS = 1e-5  # nn.LayerNorm default


def _layernorm(v, w, b, eps):
    mu = jnp.mean(v, axis=-1, keepdims=True)
    c = v - mu
    var = jnp.mean(c * c, axis=-1, keepdims=True)
    return c * jax.lax.rsqrt(var + eps) * w + b


def _gelu_tanh(v):
    # tanh-approximate GELU (tanh goes to the EUP slot).
    # TODO(synk): PyTorch nn.GELU() uses exact erf; this approx deviates ~1e-3.
    return 0.5 * v * (1.0 + jnp.tanh(0.7978845608028654 * (v + 0.044715 * v * v * v)))


# --------------------------------------------------------------------------
# Fused Block kernel: one batch TILE (Bt elements) per grid step.
# --------------------------------------------------------------------------
def _block_kernel(x_ref, ln1w_ref, ln1b_ref, wq_ref, wk_ref, wv_ref,
                  wproj_ref, bproj_ref, ln2w_ref, ln2b_ref,
                  wfc1_ref, bfc1_ref, wfc2_ref, bfc2_ref, hsel_ref,
                  o_ref, attn_scr, *, eps):
    bt, n, c = x_ref.shape
    m = bt * n

    # Flatten the batch tile into a row slab (trivial leading-dim reshape).
    x = x_ref[...].reshape(m, c)                                 # (M, C) f32

    # ---- LayerNorm 1 (f32) + q/k/v projections (bf16 in, f32 accum) ----
    xn = _layernorm(x, ln1w_ref[...], ln1b_ref[...], eps)
    xnb = xn.astype(jnp.bfloat16)
    q = jnp.dot(xnb, wq_ref[...], preferred_element_type=jnp.float32)  # scale pre-folded
    k = jnp.dot(xnb, wk_ref[...], preferred_element_type=jnp.float32)
    v = jnp.dot(xnb, wv_ref[...], preferred_element_type=jnp.float32)

    hsel = hsel_ref[...]   # (C, C) 0/1 same-head selector, f32

    # ---- attention core: all heads at once, lane-dense in C ----
    # For each batch element b:
    #   prod[n,m,c]   = q[n,c] * k[m,c]                        (VPU)
    #   s[n,m,c]      = sum_{c' same head as c} prod[n,m,c']   (one filled matmul)
    #                 -> per-head score broadcast over that head's D lanes
    #   softmax over m (sublane reduction), then out[n,c] = sum_m p * v[m,c].
    for b in range(bt):
        r0 = b * n
        qb = q[r0:r0 + n, :]                                      # (N, C)
        kb = k[r0:r0 + n, :]
        vb = v[r0:r0 + n, :]
        prod = qb[:, None, :] * kb[None, :, :]                    # (N, N, C)
        s = jnp.dot(prod.reshape(n * n, c), hsel,
                    preferred_element_type=jnp.float32).reshape(n, n, c)
        s = s - jnp.max(s, axis=1, keepdims=True)
        p = jnp.exp(s)
        p = p * pl.reciprocal(jnp.sum(p, axis=1, keepdims=True), approx=False)
        attn_scr[pl.ds(r0, n), :] = jnp.sum(p * vb[None, :, :], axis=1)

    # ---- output projection + residual ----
    proj = jnp.dot(attn_scr[...].astype(jnp.bfloat16), wproj_ref[...],
                   preferred_element_type=jnp.float32) + bproj_ref[...]
    x1 = x + proj

    # ---- LayerNorm 2 + MLP (fc1 -> GELU -> fc2) + residual ----
    x2n = _layernorm(x1, ln2w_ref[...], ln2b_ref[...], eps)
    h1 = jnp.dot(x2n.astype(jnp.bfloat16), wfc1_ref[...],
                 preferred_element_type=jnp.float32) + bfc1_ref[...]
    h1 = _gelu_tanh(h1)
    h2 = jnp.dot(h1.astype(jnp.bfloat16), wfc2_ref[...],
                 preferred_element_type=jnp.float32) + bfc2_ref[...]

    o_ref[...] = (x1 + h2).reshape(bt, n, c).astype(o_ref.dtype)


# --------------------------------------------------------------------------
# Host-side preparation (done once, outside the hot path)
# --------------------------------------------------------------------------
def prepare_block_params(p, num_heads):
    """Pre-transpose Linear weights to (K, Nout), cast matmul weights to bf16,
    fold 1/sqrt(D) into the q columns, build the same-head selector matrix,
    and drop the (always-zero) qkv bias."""
    C = p["ln1_weight"].shape[0]
    D = C // num_heads
    scale = D ** (-0.5)
    wqkv_t = p["qkv_weight"].T.astype(jnp.float32)            # (C, 3C)
    head_ids = jnp.arange(C, dtype=jnp.int32) // D
    hsel = (head_ids[:, None] == head_ids[None, :]).astype(jnp.float32)  # (C, C)
    return dict(
        ln1_w=p["ln1_weight"].reshape(1, -1).astype(jnp.float32),
        ln1_b=p["ln1_bias"].reshape(1, -1).astype(jnp.float32),
        wq_t=(wqkv_t[:, :C] * scale).astype(jnp.bfloat16),    # scale folded in
        wk_t=wqkv_t[:, C:2 * C].astype(jnp.bfloat16),
        wv_t=wqkv_t[:, 2 * C:3 * C].astype(jnp.bfloat16),
        wproj_t=p["proj_weight"].T.astype(jnp.bfloat16),      # (C, C)
        bproj=p["proj_bias"].reshape(1, -1).astype(jnp.float32),
        ln2_w=p["ln2_weight"].reshape(1, -1).astype(jnp.float32),
        ln2_b=p["ln2_bias"].reshape(1, -1).astype(jnp.float32),
        wfc1_t=p["fc1_weight"].T.astype(jnp.bfloat16),        # (C, Hm)
        bfc1=p["fc1_bias"].reshape(1, -1).astype(jnp.float32),
        wfc2_t=p["fc2_weight"].T.astype(jnp.bfloat16),        # (Hm, C)
        bfc2=p["fc2_bias"].reshape(1, -1).astype(jnp.float32),
        hsel=hsel,
    )


def _pick_batch_tile(B, N, target_rows=256, prefer_multi_step=True):
    """Largest divisor of B with Bt*N <= target_rows (fills the MXU M dim);
    but keep >= 2 grid steps when possible so v7x's two TensorCores both work."""
    bt = 1
    for d in range(1, B + 1):
        if B % d == 0 and d * N <= target_rows:
            bt = d
    if prefer_multi_step and B // bt < 2:
        for d in range(bt, 0, -1):
            if B % d == 0 and B // d >= 2:
                bt = d
                break
    return bt


def block_forward(x, prepped, num_heads, eps=LN_EPS, target_rows=256):
    """x: (B, N, C). Returns (y, macs) mirroring Block.forward."""
    B, N, C = x.shape
    D = C // num_heads
    Hm = prepped["wfc1_t"].shape[1]

    bt = _pick_batch_tile(B, N, target_rows)
    grid = (B // bt,)
    M = bt * N

    # --- MAC bookkeeping (mirrors the PyTorch module's reporting) ---
    macs_attn = [
        B * (3 * C) * N * C,            # qkv projection
        N * B * num_heads * N * D,      # q @ k^T
        N * B * num_heads * N * D,      # attn @ v
        B * N * C * C,                  # output projection
    ]
    macs_mlp = [
        Hm * B * N * C,                 # fc1
        C * B * N * Hm,                 # fc2
    ]

    weight_bytes = sum(int(v.size) * v.dtype.itemsize for v in prepped.values())
    cost = pl.CostEstimate(
        flops=2 * sum(macs_attn + macs_mlp),
        transcendentals=B * num_heads * N * N + B * N * Hm,
        bytes_accessed=2 * x.size * x.dtype.itemsize + weight_bytes,
    )

    def fixed(shape):
        return pl.BlockSpec(shape, lambda g: (0, 0))

    kern = functools.partial(_block_kernel, eps=eps)
    # NOTE: output last dim is C; if the production C >= 128 the stores are
    # lane-dense.  At the module's C=32 this is the data's native width.
    y = pl.pallas_call(
        kern,
        out_shape=jax.ShapeDtypeStruct((B, N, C), x.dtype),
        grid=grid,
        in_specs=[
            pl.BlockSpec((bt, N, C), lambda g: (g, 0, 0)),   # x tile
            fixed((1, C)), fixed((1, C)),                    # ln1 w, b
            fixed((C, C)), fixed((C, C)), fixed((C, C)),     # wq^T, wk^T, wv^T (bf16)
            fixed((C, C)), fixed((1, C)),                    # proj W^T, b
            fixed((1, C)), fixed((1, C)),                    # ln2 w, b
            fixed((C, Hm)), fixed((1, Hm)),                  # fc1 W^T, b
            fixed((Hm, C)), fixed((1, C)),                   # fc2 W^T, b
            fixed((C, C)),                                   # same-head selector
        ],
        out_specs=pl.BlockSpec((bt, N, C), lambda g: (g, 0, 0)),
        scratch_shapes=[
            pltpu.VMEM((M, C), jnp.float32),                 # lane-dense attention output
        ],
        compiler_params=pltpu.CompilerParams(
            dimension_semantics=("parallel",),
            vmem_limit_bytes=48 * 1024 * 1024),
        cost_estimate=cost,
    )(x, prepped["ln1_w"], prepped["ln1_b"],
      prepped["wq_t"], prepped["wk_t"], prepped["wv_t"],
      prepped["wproj_t"], prepped["bproj"],
      prepped["ln2_w"], prepped["ln2_b"],
      prepped["wfc1_t"], prepped["bfc1"],
      prepped["wfc2_t"], prepped["bfc2"],
      prepped["hsel"])

    return y, macs_attn + macs_mlp


# --------------------------------------------------------------------------
# Pure-JAX (f32) reference for sanity checking
# --------------------------------------------------------------------------
def block_reference(x, p, num_heads, eps=LN_EPS):
    B, N, C = x.shape
    D = C // num_heads
    scale = D ** (-0.5)

    def ln(v, w, b):
        mu = v.mean(-1, keepdims=True)
        var = ((v - mu) ** 2).mean(-1, keepdims=True)
        return (v - mu) / jnp.sqrt(var + eps) * w + b

    h = ln(x, p["ln1_weight"], p["ln1_bias"])
    qkv = h @ p["qkv_weight"].T                         # qkv_bias=False in the module
    qkv = qkv.reshape(B, N, 3, num_heads, D).transpose(2, 0, 3, 1, 4)
    q, k, v = qkv[0], qkv[1], qkv[2]
    attn = jnp.einsum("bhnd,bhmd->bhnm", q, k) * scale
    attn = jax.nn.softmax(attn, axis=-1)
    o = jnp.einsum("bhnm,bhmd->bhnd", attn, v)
    o = o.transpose(0, 2, 1, 3).reshape(B, N, C)
    o = o @ p["proj_weight"].T + p["proj_bias"]
    x1 = x + o

    h2 = ln(x1, p["ln2_weight"], p["ln2_bias"])
    h2 = h2 @ p["fc1_weight"].T + p["fc1_bias"]
    h2 = _gelu_tanh(h2)
    h2 = h2 @ p["fc2_weight"].T + p["fc2_bias"]
    return x1 + h2


if __name__ == "__main__":
    # Small shapes consistent with the module: B=2, N=8, C=32, heads=8 (D=4),
    # mlp_ratio=4.0 -> hidden=128.
    B, N, C = 2, 8, 32
    num_heads = 8
    Hm = int(C * 4.0)

    key = jax.random.PRNGKey(0)
    keys = jax.random.split(key, 12)

    x = jax.random.normal(keys[0], (B, N, C), jnp.float32)
    raw = {
        "ln1_weight": 1.0 + 0.1 * jax.random.normal(keys[1], (C,), jnp.float32),
        "ln1_bias": 0.1 * jax.random.normal(keys[2], (C,), jnp.float32),
        # qkv_bias=False in the module -> no bias term
        "qkv_weight": jax.random.normal(keys[3], (3 * C, C), jnp.float32) * 0.05,
        "proj_weight": jax.random.normal(keys[4], (C, C), jnp.float32) * 0.05,
        "proj_bias": jax.random.normal(keys[5], (C,), jnp.float32) * 0.05,
        "ln2_weight": 1.0 + 0.1 * jax.random.normal(keys[6], (C,), jnp.float32),
        "ln2_bias": 0.1 * jax.random.normal(keys[7], (C,), jnp.float32),
        "fc1_weight": jax.random.normal(keys[8], (Hm, C), jnp.float32) * 0.05,
        "fc1_bias": jax.random.normal(keys[9], (Hm,), jnp.float32) * 0.05,
        "fc2_weight": jax.random.normal(keys[10], (C, Hm), jnp.float32) * 0.05,
        "fc2_bias": jax.random.normal(keys[11], (C,), jnp.float32) * 0.05,
    }

    prepped = prepare_block_params(raw, num_heads)
    y, macs = block_forward(x, prepped, num_heads)
    y = jax.block_until_ready(y)

    y_ref = block_reference(x, raw, num_heads)
    assert y.shape == (B, N, C)
    assert len(macs) == 6
    # tolerance accounts for bf16 matmul operands in the kernel (f32 accumulation)
    assert jnp.allclose(y, y_ref, atol=2e-2, rtol=2e-2), "mismatch vs reference"

    print("KERNEL_OK")
</pallas_src>

<mosaic_0001>
module attributes {stable_mosaic.version = 11 : i64} {
  func.func @_block_kernel(%arg0: i32, %arg1: memref<1x8x32xf32, #tpu.memory_space<vmem>>, %arg2: memref<1x32xf32, #tpu.memory_space<vmem>>, %arg3: memref<1x32xf32, #tpu.memory_space<vmem>>, %arg4: memref<32x32xbf16, #tpu.memory_space<vmem>>, %arg5: memref<32x32xbf16, #tpu.memory_space<vmem>>, %arg6: memref<32x32xbf16, #tpu.memory_space<vmem>>, %arg7: memref<32x32xbf16, #tpu.memory_space<vmem>>, %arg8: memref<1x32xf32, #tpu.memory_space<vmem>>, %arg9: memref<1x32xf32, #tpu.memory_space<vmem>>, %arg10: memref<1x32xf32, #tpu.memory_space<vmem>>, %arg11: memref<32x128xbf16, #tpu.memory_space<vmem>>, %arg12: memref<1x128xf32, #tpu.memory_space<vmem>>, %arg13: memref<128x32xbf16, #tpu.memory_space<vmem>>, %arg14: memref<1x32xf32, #tpu.memory_space<vmem>>, %arg15: memref<32x32xf32, #tpu.memory_space<vmem>>, %arg16: memref<1x8x32xf32, #tpu.memory_space<vmem>>, %arg17: memref<8x32xf32, #tpu.memory_space<vmem>>) attributes {dimension_semantics = [#tpu.dimension_semantics<parallel>], iteration_bounds = array<i64: 2>, scalar_prefetch = 0 : i64, scratch_operands = 1 : i64, tpu.core_type = #tpu.core_type<tc>, window_params = [{transform_indices = @transform_0, window_bounds = array<i64: 1, 8, 32>}, {pipeline_mode = #tpu.pipeline_mode<synchronous>, transform_indices = @transform_1, window_bounds = array<i64: 1, 32>}, {pipeline_mode = #tpu.pipeline_mode<synchronous>, transform_indices = @transform_2, window_bounds = array<i64: 1, 32>}, {pipeline_mode = #tpu.pipeline_mode<synchronous>, transform_indices = @transform_3, window_bounds = array<i64: 32, 32>}, {pipeline_mode = #tpu.pipeline_mode<synchronous>, transform_indices = @transform_4, window_bounds = array<i64: 32, 32>}, {pipeline_mode = #tpu.pipeline_mode<synchronous>, transform_indices = @transform_5, window_bounds = array<i64: 32, 32>}, {pipeline_mode = #tpu.pipeline_mode<synchronous>, transform_indices = @transform_6, window_bounds = array<i64: 32, 32>}, {pipeline_mode = #tpu.pipeline_mode<synchronous>, transform_indices = @transform_7, window_bounds = array<i64: 1, 32>}, {pipeline_mode = #tpu.pipeline_mode<synchronous>, transform_indices = @transform_8, window_bounds = array<i64: 1, 32>}, {pipeline_mode = #tpu.pipeline_mode<synchronous>, transform_indices = @transform_9, window_bounds = array<i64: 1, 32>}, {pipeline_mode = #tpu.pipeline_mode<synchronous>, transform_indices = @transform_10, window_bounds = array<i64: 32, 128>}, {pipeline_mode = #tpu.pipeline_mode<synchronous>, transform_indices = @transform_11, window_bounds = array<i64: 1, 128>}, {pipeline_mode = #tpu.pipeline_mode<synchronous>, transform_indices = @transform_12, window_bounds = array<i64: 128, 32>}, {pipeline_mode = #tpu.pipeline_mode<synchronous>, transform_indices = @transform_13, window_bounds = array<i64: 1, 32>}, {pipeline_mode = #tpu.pipeline_mode<synchronous>, transform_indices = @transform_14, window_bounds = array<i64: 32, 32>}, {transform_indices = @transform_15, window_bounds = array<i64: 1, 8, 32>}]} {
    %c0 = arith.constant 0 : index
    %c0_0 = arith.constant 0 : index
    %c0_1 = arith.constant 0 : index
    %0 = vector.load %arg1[%c0, %c0_0, %c0_1] : memref<1x8x32xf32, #tpu.memory_space<vmem>>, vector<1x8x32xf32>
    %1 = vector.shape_cast %0 : vector<1x8x32xf32> to vector<8x32xf32>
    %c0_2 = arith.constant 0 : index
    %c0_3 = arith.constant 0 : index
    %2 = vector.load %arg2[%c0_2, %c0_3] : memref<1x32xf32, #tpu.memory_space<vmem>>, vector<1x32xf32>
    %c0_4 = arith.constant 0 : index
    %c0_5 = arith.constant 0 : index
    %3 = vector.load %arg3[%c0_4, %c0_5] : memref<1x32xf32, #tpu.memory_space<vmem>>, vector<1x32xf32>
    %cst = arith.constant dense<0.000000e+00> : vector<8xf32>
    %4 = vector.multi_reduction <add>, %1, %cst [1] : vector<8x32xf32> to vector<8xf32>
    %5 = vector.shape_cast %4 : vector<8xf32> to vector<8x1xf32>
    %cst_6 = arith.constant 3.200000e+01 : f32
    %6 = vector.broadcast %cst_6 : f32 to vector<8x1xf32>
    %7 = arith.divf %5, %6 : vector<8x1xf32>
    %8 = vector.broadcast %7 : vector<8x1xf32> to vector<8x32xf32>
    %9 = arith.subf %1, %8 : vector<8x32xf32>
    %10 = arith.mulf %9, %9 : vector<8x32xf32>
    %cst_7 = arith.constant dense<0.000000e+00> : vector<8xf32>
    %11 = vector.multi_reduction <add>, %10, %cst_7 [1] : vector<8x32xf32> to vector<8xf32>
    %12 = vector.shape_cast %11 : vector<8xf32> to vector<8x1xf32>
    %cst_8 = arith.constant 3.200000e+01 : f32
    %13 = vector.broadcast %cst_8 : f32 to vector<8x1xf32>
    %14 = arith.divf %12, %13 : vector<8x1xf32>
    %cst_9 = arith.constant 9.99999974E-6 : f32
    %15 = vector.broadcast %cst_9 : f32 to vector<8x1xf32>
    %16 = arith.addf %14, %15 : vector<8x1xf32>
    %17 = math.rsqrt %16 : vector<8x1xf32>
    %18 = vector.broadcast %17 : vector<8x1xf32> to vector<8x32xf32>
    %19 = arith.mulf %9, %18 : vector<8x32xf32>
    %20 = vector.broadcast %2 : vector<1x32xf32> to vector<8x32xf32>
    %21 = arith.mulf %19, %20 : vector<8x32xf32>
    %22 = vector.broadcast %3 : vector<1x32xf32> to vector<8x32xf32>
    %23 = arith.addf %21, %22 : vector<8x32xf32>
    %24 = arith.truncf %23 : vector<8x32xf32> to vector<8x32xbf16>
    %c0_10 = arith.constant 0 : index
    %c0_11 = arith.constant 0 : index
    %25 = vector.load %arg4[%c0_10, %c0_11] : memref<32x32xbf16, #tpu.memory_space<vmem>>, vector<32x32xbf16>
    %cst_12 = arith.constant dense<0.000000e+00> : vector<8x32xf32>
    %26 = tpu.matmul %24, %25, %cst_12 {dimension_numbers = #tpu.dot_dimension_numbers<[1], [0], [0], [1], [0, 0, 1, 1], [], []>} : vector<8x32xbf16>, vector<32x32xbf16>, vector<8x32xf32> -> vector<8x32xf32>
    %c0_13 = arith.constant 0 : index
    %c0_14 = arith.constant 0 : index
    %27 = vector.load %arg5[%c0_13, %c0_14] : memref<32x32xbf16, #tpu.memory_space<vmem>>, vector<32x32xbf16>
    %cst_15 = arith.constant dense<0.000000e+00> : vector<8x32xf32>
    %28 = tpu.matmul %24, %27, %cst_15 {dimension_numbers = #tpu.dot_dimension_numbers<[1], [0], [0], [1], [0, 0, 1, 1], [], []>} : vector<8x32xbf16>, vector<32x32xbf16>, vector<8x32xf32> -> vector<8x32xf32>
    %c0_16 = arith.constant 0 : index
    %c0_17 = arith.constant 0 : index
    %29 = vector.load %arg6[%c0_16, %c0_17] : memref<32x32xbf16, #tpu.memory_space<vmem>>, vector<32x32xbf16>
    %cst_18 = arith.constant dense<0.000000e+00> : vector<8x32xf32>
    %30 = tpu.matmul %24, %29, %cst_18 {dimension_numbers = #tpu.dot_dimension_numbers<[1], [0], [0], [1], [0, 0, 1, 1], [], []>} : vector<8x32xbf16>, vector<32x32xbf16>, vector<8x32xf32> -> vector<8x32xf32>
    %c0_19 = arith.constant 0 : index
    %c0_20 = arith.constant 0 : index
    %31 = vector.load %arg15[%c0_19, %c0_20] : memref<32x32xf32, #tpu.memory_space<vmem>>, vector<32x32xf32>
    %32 = vector.shape_cast %26 : vector<8x32xf32> to vector<8x1x32xf32>
    %33 = vector.shape_cast %28 : vector<8x32xf32> to vector<1x8x32xf32>
    %34 = vector.broadcast %32 : vector<8x1x32xf32> to vector<8x8x32xf32>
    %35 = vector.broadcast %33 : vector<1x8x32xf32> to vector<8x8x32xf32>
    %36 = arith.mulf %34, %35 : vector<8x8x32xf32>
    %37 = vector.shape_cast %36 : vector<8x8x32xf32> to vector<64x32xf32>
    %cst_21 = arith.constant dense<0.000000e+00> : vector<64x32xf32>
    %38 = tpu.matmul %37, %31, %cst_21 {dimension_numbers = #tpu.dot_dimension_numbers<[1], [0], [0], [1], [0, 0, 1, 1], [], []>} : vector<64x32xf32>, vector<32x32xf32>, vector<64x32xf32> -> vector<64x32xf32>
    %39 = vector.shape_cast %38 : vector<64x32xf32> to vector<8x8x32xf32>
    %cst_22 = arith.constant dense<0xFF800000> : vector<8x32xf32>
    %40 = vector.multi_reduction <maximumf>, %39, %cst_22 [1] : vector<8x8x32xf32> to vector<8x32xf32>
    %41 = vector.shape_cast %40 : vector<8x32xf32> to vector<8x1x32xf32>
    %42 = vector.broadcast %41 : vector<8x1x32xf32> to vector<8x8x32xf32>
    %43 = arith.subf %39, %42 : vector<8x8x32xf32>
    %44 = math.exp %43 : vector<8x8x32xf32>
    %cst_23 = arith.constant dense<0.000000e+00> : vector<8x32xf32>
    %45 = vector.multi_reduction <add>, %44, %cst_23 [1] : vector<8x8x32xf32> to vector<8x32xf32>
    %46 = vector.shape_cast %45 : vector<8x32xf32> to vector<8x1x32xf32>
    %47 = tpu.reciprocal %46 : vector<8x1x32xf32> -> vector<8x1x32xf32>
    %48 = vector.broadcast %47 : vector<8x1x32xf32> to vector<8x8x32xf32>
    %49 = arith.mulf %44, %48 : vector<8x8x32xf32>
    %50 = vector.shape_cast %30 : vector<8x32xf32> to vector<1x8x32xf32>
    %51 = vector.broadcast %50 : vector<1x8x32xf32> to vector<8x8x32xf32>
    %52 = arith.mulf %49, %51 : vector<8x8x32xf32>
    %cst_24 = arith.constant dense<0.000000e+00> : vector<8x32xf32>
    %53 = vector.multi_reduction <add>, %52, %cst_24 [1] : vector<8x8x32xf32> to vector<8x32xf32>
    %c0_25 = arith.constant 0 : index
    %c0_26 = arith.constant 0 : index
    %54 = vector.load %arg17[%c0_25, %c0_26] : memref<8x32xf32, #tpu.memory_space<vmem>>, vector<8x32xf32>
    tpu.vector_store %arg17[%c0_25, %c0_26], %53 {strides = array<i32>} : memref<8x32xf32, #tpu.memory_space<vmem>>, vector<8x32xf32>,
    %c0_27 = arith.constant 0 : index
    %c0_28 = arith.constant 0 : index
    %55 = vector.load %arg17[%c0_27, %c0_28] : memref<8x32xf32, #tpu.memory_space<vmem>>, vector<8x32xf32>
    %56 = arith.truncf %55 : vector<8x32xf32> to vector<8x32xbf16>
    %c0_29 = arith.constant 0 : index
    %c0_30 = arith.constant 0 : index
    %57 = vector.load %arg7[%c0_29, %c0_30] : memref<32x32xbf16, #tpu.memory_space<vmem>>, vector<32x32xbf16>
    %cst_31 = arith.constant dense<0.000000e+00> : vector<8x32xf32>
    %58 = tpu.matmul %56, %57, %cst_31 {dimension_numbers = #tpu.dot_dimension_numbers<[1], [0], [0], [1], [0, 0, 1, 1], [], []>} : vector<8x32xbf16>, vector<32x32xbf16>, vector<8x32xf32> -> vector<8x32xf32>
    %c0_32 = arith.constant 0 : index
    %c0_33 = arith.constant 0 : index
    %59 = vector.load %arg8[%c0_32, %c0_33] : memref<1x32xf32, #tpu.memory_space<vmem>>, vector<1x32xf32>
    %60 = vector.broadcast %59 : vector<1x32xf32> to vector<8x32xf32>
    %61 = arith.addf %58, %60 : vector<8x32xf32>
    %62 = arith.addf %1, %61 : vector<8x32xf32>
    %c0_34 = arith.constant 0 : index
    %c0_35 = arith.constant 0 : index
    %63 = vector.load %arg9[%c0_34, %c0_35] : memref<1x32xf32, #tpu.memory_space<vmem>>, vector<1x32xf32>
    %c0_36 = arith.constant 0 : index
    %c0_37 = arith.constant 0 : index
    %64 = vector.load %arg10[%c0_36, %c0_37] : memref<1x32xf32, #tpu.memory_space<vmem>>, vector<1x32xf32>
    %cst_38 = arith.constant dense<0.000000e+00> : vector<8xf32>
    %65 = vector.multi_reduction <add>, %62, %cst_38 [1] : vector<8x32xf32> to vector<8xf32>
    %66 = vector.shape_cast %65 : vector<8xf32> to vector<8x1xf32>
    %cst_39 = arith.constant 3.200000e+01 : f32
    %67 = vector.broadcast %cst_39 : f32 to vector<8x1xf32>
    %68 = arith.divf %66, %67 : vector<8x1xf32>
    %69 = vector.broadcast %68 : vector<8x1xf32> to vector<8x32xf32>
    %70 = arith.subf %62, %69 : vector<8x32xf32>
    %71 = arith.mulf %70, %70 : vector<8x32xf32>
    %cst_40 = arith.constant dense<0.000000e+00> : vector<8xf32>
    %72 = vector.multi_reduction <add>, %71, %cst_40 [1] : vector<8x32xf32> to vector<8xf32>
    %73 = vector.shape_cast %72 : vector<8xf32> to vector<8x1xf32>
    %cst_41 = arith.constant 3.200000e+01 : f32
    %74 = vector.broadcast %cst_41 : f32 to vector<8x1xf32>
    %75 = arith.divf %73, %74 : vector<8x1xf32>
    %cst_42 = arith.constant 9.99999974E-6 : f32
    %76 = vector.broadcast %cst_42 : f32 to vector<8x1xf32>
    %77 = arith.addf %75, %76 : vector<8x1xf32>
    %78 = math.rsqrt %77 : vector<8x1xf32>
    %79 = vector.broadcast %78 : vector<8x1xf32> to vector<8x32xf32>
    %80 = arith.mulf %70, %79 : vector<8x32xf32>
    %81 = vector.broadcast %63 : vector<1x32xf32> to vector<8x32xf32>
    %82 = arith.mulf %80, %81 : vector<8x32xf32>
    %83 = vector.broadcast %64 : vector<1x32xf32> to vector<8x32xf32>
    %84 = arith.addf %82, %83 : vector<8x32xf32>
    %85 = arith.truncf %84 : vector<8x32xf32> to vector<8x32xbf16>
    %c0_43 = arith.constant 0 : index
    %c0_44 = arith.constant 0 : index
    %86 = vector.load %arg11[%c0_43, %c0_44] : memref<32x128xbf16, #tpu.memory_space<vmem>>, vector<32x128xbf16>
    %cst_45 = arith.constant dense<0.000000e+00> : vector<8x128xf32>
    %87 = tpu.matmul %85, %86, %cst_45 {dimension_numbers = #tpu.dot_dimension_numbers<[1], [0], [0], [1], [0, 0, 1, 1], [], []>} : vector<8x32xbf16>, vector<32x128xbf16>, vector<8x128xf32> -> vector<8x128xf32>
    %c0_46 = arith.constant 0 : index
    %c0_47 = arith.constant 0 : index
    %88 = vector.load %arg12[%c0_46, %c0_47] : memref<1x128xf32, #tpu.memory_space<vmem>>, vector<1x128xf32>
    %89 = vector.broadcast %88 : vector<1x128xf32> to vector<8x128xf32>
    %90 = arith.addf %87, %89 : vector<8x128xf32>
    %cst_48 = arith.constant 5.000000e-01 : f32
    %91 = vector.broadcast %cst_48 : f32 to vector<8x128xf32>
    %92 = arith.mulf %91, %90 : vector<8x128xf32>
    %cst_49 = arith.constant 4.471500e-02 : f32
    %93 = vector.broadcast %cst_49 : f32 to vector<8x128xf32>
    %94 = arith.mulf %93, %90 : vector<8x128xf32>
    %95 = arith.mulf %94, %90 : vector<8x128xf32>
    %96 = arith.mulf %95, %90 : vector<8x128xf32>
    %97 = arith.addf %90, %96 : vector<8x128xf32>
    %cst_50 = arith.constant 0.797884583 : f32
    %98 = vector.broadcast %cst_50 : f32 to vector<8x128xf32>
    %99 = arith.mulf %98, %97 : vector<8x128xf32>
    %100 = math.tanh %99 : vector<8x128xf32>
    %cst_51 = arith.constant 1.000000e+00 : f32
    %101 = vector.broadcast %cst_51 : f32 to vector<8x128xf32>
    %102 = arith.addf %101, %100 : vector<8x128xf32>
    %103 = arith.mulf %92, %102 : vector<8x128xf32>
    %104 = arith.truncf %103 : vector<8x128xf32> to vector<8x128xbf16>
    %c0_52 = arith.constant 0 : index
    %c0_53 = arith.constant 0 : index
    %105 = vector.load %arg13[%c0_52, %c0_53] : memref<128x32xbf16, #tpu.memory_space<vmem>>, vector<128x32xbf16>
    %cst_54 = arith.constant dense<0.000000e+00> : vector<8x32xf32>
    %106 = tpu.matmul %104, %105, %cst_54 {dimension_numbers = #tpu.dot_dimension_numbers<[1], [0], [0], [1], [0, 0, 1, 1], [], []>} : vector<8x128xbf16>, vector<128x32xbf16>, vector<8x32xf32> -> vector<8x32xf32>
    %c0_55 = arith.constant 0 : index
    %c0_56 = arith.constant 0 : index
    %107 = vector.load %arg14[%c0_55, %c0_56] : memref<1x32xf32, #tpu.memory_space<vmem>>, vector<1x32xf32>
    %108 = vector.broadcast %107 : vector<1x32xf32> to vector<8x32xf32>
    %109 = arith.addf %106, %108 : vector<8x32xf32>
    %110 = arith.addf %62, %109 : vector<8x32xf32>
    %111 = vector.shape_cast %110 : vector<8x32xf32> to vector<1x8x32xf32>
    %c0_57 = arith.constant 0 : index
    %c0_58 = arith.constant 0 : index
    %c0_59 = arith.constant 0 : index
    %112 = vector.load %arg16[%c0_57, %c0_58, %c0_59] : memref<1x8x32xf32, #tpu.memory_space<vmem>>, vector<1x8x32xf32>
    tpu.vector_store %arg16[%c0_57, %c0_58, %c0_59], %111 {strides = array<i32>} : memref<1x8x32xf32, #tpu.memory_space<vmem>>, vector<1x8x32xf32>,
    return
  }
  func.func @transform_0(%arg0: i32) -> (i32, i32, i32) {
    %c0_i32 = arith.constant 0 : i32
    %c0_i32_0 = arith.constant 0 : i32
    %c0_i32_1 = arith.constant 0 : i32
    return %arg0, %c0_i32, %c0_i32_0 : i32, i32, i32
  }
  func.func @transform_1(%arg0: i32) -> (i32, i32) {
    %c0_i32 = arith.constant 0 : i32
    %c0_i32_0 = arith.constant 0 : i32
    %c0_i32_1 = arith.constant 0 : i32
    return %c0_i32, %c0_i32_0 : i32, i32
  }
  func.func @transform_2(%arg0: i32) -> (i32, i32) {
    %c0_i32 = arith.constant 0 : i32
    %c0_i32_0 = arith.constant 0 : i32
    %c0_i32_1 = arith.constant 0 : i32
    return %c0_i32, %c0_i32_0 : i32, i32
  }
  func.func @transform_3(%arg0: i32) -> (i32, i32) {
    %c0_i32 = arith.constant 0 : i32
    %c0_i32_0 = arith.constant 0 : i32
    %c0_i32_1 = arith.constant 0 : i32
    return %c0_i32, %c0_i32_0 : i32, i32
  }
  func.func @transform_4(%arg0: i32) -> (i32, i32) {
    %c0_i32 = arith.constant 0 : i32
    %c0_i32_0 = arith.constant 0 : i32
    %c0_i32_1 = arith.constant 0 : i32
    return %c0_i32, %c0_i32_0 : i32, i32
  }
  func.func @transform_5(%arg0: i32) -> (i32, i32) {
    %c0_i32 = arith.constant 0 : i32
    %c0_i32_0 = arith.constant 0 : i32
    %c0_i32_1 = arith.constant 0 : i32
    return %c0_i32, %c0_i32_0 : i32, i32
  }
  func.func @transform_6(%arg0: i32) -> (i32, i32) {
    %c0_i32 = arith.constant 0 : i32
    %c0_i32_0 = arith.constant 0 : i32
    %c0_i32_1 = arith.constant 0 : i32
    return %c0_i32, %c0_i32_0 : i32, i32
  }
  func.func @transform_7(%arg0: i32) -> (i32, i32) {
    %c0_i32 = arith.constant 0 : i32
    %c0_i32_0 = arith.constant 0 : i32
    %c0_i32_1 = arith.constant 0 : i32
    return %c0_i32, %c0_i32_0 : i32, i32
  }
  func.func @transform_8(%arg0: i32) -> (i32, i32) {
    %c0_i32 = arith.constant 0 : i32
    %c0_i32_0 = arith.constant 0 : i32
    %c0_i32_1 = arith.constant 0 : i32
    return %c0_i32, %c0_i32_0 : i32, i32
  }
  func.func @transform_9(%arg0: i32) -> (i32, i32) {
    %c0_i32 = arith.constant 0 : i32
    %c0_i32_0 = arith.constant 0 : i32
    %c0_i32_1 = arith.constant 0 : i32
    return %c0_i32, %c0_i32_0 : i32, i32
  }
  func.func @transform_10(%arg0: i32) -> (i32, i32) {
    %c0_i32 = arith.constant 0 : i32
    %c0_i32_0 = arith.constant 0 : i32
    %c0_i32_1 = arith.constant 0 : i32
    return %c0_i32, %c0_i32_0 : i32, i32
  }
  func.func @transform_11(%arg0: i32) -> (i32, i32) {
    %c0_i32 = arith.constant 0 : i32
    %c0_i32_0 = arith.constant 0 : i32
    %c0_i32_1 = arith.constant 0 : i32
    return %c0_i32, %c0_i32_0 : i32, i32
  }
  func.func @transform_12(%arg0: i32) -> (i32, i32) {
    %c0_i32 = arith.constant 0 : i32
    %c0_i32_0 = arith.constant 0 : i32
    %c0_i32_1 = arith.constant 0 : i32
    return %c0_i32, %c0_i32_0 : i32, i32
  }
  func.func @transform_13(%arg0: i32) -> (i32, i32) {
    %c0_i32 = arith.constant 0 : i32
    %c0_i32_0 = arith.constant 0 : i32
    %c0_i32_1 = arith.constant 0 : i32
    return %c0_i32, %c0_i32_0 : i32, i32
  }
  func.func @transform_14(%arg0: i32) -> (i32, i32) {
    %c0_i32 = arith.constant 0 : i32
    %c0_i32_0 = arith.constant 0 : i32
    %c0_i32_1 = arith.constant 0 : i32
    return %c0_i32, %c0_i32_0 : i32, i32
  }
  func.func @transform_15(%arg0: i32) -> (i32, i32, i32) {
    %c0_i32 = arith.constant 0 : i32
    %c0_i32_0 = arith.constant 0 : i32
    %c0_i32_1 = arith.constant 0 : i32
    return %arg0, %c0_i32, %c0_i32_0 : i32, i32, i32
  }
}

</mosaic_0001>

<bundles_post_ra>
// kernel: tpu_custom_call.1
= control target key start
LH: loop header
LB: loop body
LE: loop exit
PB: predicated region body
PF: predicated region fallthrough
CT: control target
= control target key end

     0   :  { %s2446_s0 = inlined_call_operand.vmem [shape: f32[2,8,32], index: 0, kind: input, shape index: {}]   ;;  %s2447_s1 = inlined_call_operand.hbm [shape: f32[1,32], index: 1, kind: input, shape index: {}]   ;;  %s2448_s2 = inlined_call_operand.vmem [shape: f32[1,32], index: 2, kind: input, shape index: {}]   ;;  %s2449_s3 = inlined_call_operand.vmem [shape: bf16[32,32], index: 3, kind: input, shape index: {}]   ;;  %s2450_s4 = inlined_call_operand.vmem [shape: bf16[32,32], index: 4, kind: input, shape index: {}]   ;;  %s2451_s5 = inlined_call_operand.hbm [shape: bf16[32,32], index: 5, kind: input, shape index: {}]   ;;  %s2452_s6 = inlined_call_operand.hbm [shape: bf16[32,32], index: 6, kind: input, shape index: {}]   ;;  %s2453_s7 = inlined_call_operand.vmem [shape: f32[1,32], index: 7, kind: input, shape index: {}]   ;;  %s2454_s8 = inlined_call_operand.vmem [shape: f32[1,32], index: 8, kind: input, shape index: {}]   ;;  %s2455_s9 = inlined_call_operand.vmem [shape: f32[1,32], index: 9, kind: input, shape index: {}]   ;;  %s2456_s10 = inlined_call_operand.hbm [shape: bf16[32,128], index: 10, kind: input, shape index: {}]   ;;  %s2457_s11 = inlined_call_operand.vmem [shape: f32[1,128], index: 11, kind: input, shape index: {}]   ;;  %s2458_s12 = inlined_call_operand.vmem [shape: bf16[128,32], index: 12, kind: input, shape index: {}]   ;;  %s2459_s13 = inlined_call_operand.vmem [shape: f32[1,32], index: 13, kind: input, shape index: {}]   ;;  %s2460_s14 = inlined_call_operand.vmem [shape: f32[32,32], index: 14, kind: input, shape index: {}]   ;;  %s2461_s15 = inlined_call_operand.hbm [shape: f32[2,8,32], index: 15, kind: output, shape index: {}]  }
   0x1   :  { %2471 = sst [smem:[#allocation23_spill]] %s2447_s1 }
   0x2   :  { %2472 = sst [smem:[#allocation24_spill]] %s2451_s5 }
   0x3   :  { %2473 = sst [smem:[#allocation25_spill]] %s2459_s13 }
   0x4   :  { %2474 = sst [smem:[#allocation26_spill]] %s2461_s15 }
   0x5   :  { %20 = vsyncpa [#allocation4], 0 }
   0x6   :  { %21 = vsyncpa [#allocation7], 0 }
   0x7   :  { %22 = vsyncpa [#allocation10], 0 }
   0x8   :  { %23 = vsyncpa [#allocation5], 0 }
   0x9   :  { %25 = vsyncpa [#allocation5 + $0x1], 0  ;;  %s1992_s18 = smov 0   ;;  %s1994_s19 = smov 0  }
   0xa   :  { %s1996_s20 = smov 0   ;;  %s1998_s21 = smov 0  }
   0xb LB: > { %2475 = sst [smem:[#allocation16_spill]] %s1891_s18  ;;  %s2013_s22 = sadd.s32 4294967295, %s1903_s21   ;;  %s1903_s21 = sphi %s1998_s21, %s2511_s21   ;;  %s1899_s20 = sphi %s1996_s20, %s2513_s20   ;;  %s1895_s19 = sphi %s1994_s19, %s2515_s19   ;;  %s1891_s18 = sphi %s1992_s18, %s2514_s18  }
   0xc   : > { %2476 = sst [smem:[#allocation17_spill]] %s1899_s20  ;;  %s1450_s23 = sadd.s32 4294967294, %s1903_s21  }
   0xd   : > { %2477 = sst [smem:[#allocation18_spill]] %s1903_s21  ;;  %s2017_s24 = sadd.s32 1, %s1903_s21  }
   0xe   : > { %2478 = sst [smem:[#allocation19_spill]] %s2017_s24  ;;  %s358_s25 = sadd.s32 1, %s1899_s20 }
   0xf   : > { %s355_s26 = ssub.s32 %s1903_s21, %s2017_s24  ;;  %p368_p0 = scmp.ne.s32.totalorder %s1899_s20, %s1895_s19 }
  0x10   : > { %p356_p1 = scmp.eq.s32.totalorder %s355_s26, 0  ;;  %p369_p2 = scmp.eq.s32.totalorder %s2013_s22, 1 }
  0x11   : > { %p374_p3 = scmp.ne.s32.totalorder %s1895_s19, %s1891_s18  ;;  %p375_p4 = scmp.eq.s32.totalorder %s1450_s23, 1 }
  0x12   : > { %s2028_s27 = scalar_select %p356_p1, %s1899_s20, %s358_s25  }
  0x13   : > { %p2030_p5 = por %p369_p2, %p368_p0  ;;  %p2034_p6 = por %p375_p4, %p374_p3 }
  0x14   : > { %2479 = sst [smem:[#allocation20_spill]] %s2028_s27  ;;  %p1451_p7 = scmp.ge.s32.totalorder %s1903_s21, 1 }
  0x15   : > { %s2480_s28 = scalar_select %p2030_p5, 1, 0 }
  0x16   : > { %s2482_s29 = scalar_select %p2034_p6, 1, 0 }
  0x17   : > { %2481 = sst [smem:[#allocation21_spill]] %s2480_s28  ;;  %p382_p8 = scmp.lt.s32.totalorder %s1903_s21, 3 }
  0x18   : > { %2483 = sst [smem:[#allocation22_spill]] %s2482_s29  ;;  %p1614_p9 = scmp.eq.s32.totalorder %s2013_s22, 0 }
  0x19   : > { %p2041_p10 = pnand %p1451_p7, %p382_p8  ;;  %s2485_s5 = sld [smem:[#allocation24_spill]] }
  0x1a   : > { %s1905_s25 = smov [#allocation6]   ;;  %s2487_s1 = sld [smem:[#allocation23_spill]] }
  0x1b   : > { %p1597_p11 = pneg %p2041_p10  ;;  %s416_s26 = sshll.u32 %s1905_s25, 4  ;;  %s417_s26 = int_to_ptr.vmem [resolvable:$true] %s416_s26 }
  0x1c   : > { %s1906_s16 = smov 64   ;;  %s1907_s17 = smov 4  }
  0x1d   : > { %p2052_p12 = pnand %p1614_p9, %p1597_p11  ;;  %s1908_s25 = smov [#allocation3]  }
  0x1e   : > { %s428_s28 = sshll.u32 %s2452_s6, 4  ;;  %s1909_s15 = smov [#allocation8]   ;;  %s429_s28 = int_to_ptr.hbm [resolvable:$true] %s428_s28 }
  0x1f   : > { %s414_s23 = sshll.u32 %s2485_s5, 4  ;;  %s396_s5 = sshll.u32 %s1908_s25, 4  ;;  %s415_s23 = int_to_ptr.hbm [resolvable:$true] %s414_s23  ;;  %s397_s5 = int_to_ptr.vmem [resolvable:$true] %s396_s5 }
  0x20   : > { %s394_s29 = sshll.u32 %s2487_s1, 4  ;;  %s451_s1 = sshll.u32 %s2456_s10, 4  ;;  %s395_s29 = int_to_ptr.hbm [resolvable:$true] %s394_s29  ;;  %s452_s1 = int_to_ptr.hbm [resolvable:$true] %s451_s1 }
  0x21   : > { %1603 = dma.hbm_to_vmem [thread:$0]  (!%p2052_p12), %s415_s23, 256, %s417_s26, [#allocation7], %s1906_s16, %s1906_s16, %s1907_s17  }
  0x22   : > { %1600 = dma.hbm_to_vmem [thread:$0]  (!%p2052_p12), %s395_s29, 16, %s397_s5, [#allocation4]  }
  0x23   : > { %s430_s13 = sshll.u32 %s1909_s15, 4  ;;  %s1910_s23 = smov [#allocation9]   ;;  %s431_s13 = int_to_ptr.vmem [resolvable:$true] %s430_s13 }
  0x24   : > { %1606 = dma.hbm_to_vmem [thread:$0]  (!%p2052_p12), %s429_s28, 256, %s431_s13, [#allocation7], %s1906_s16, %s1906_s16, %s1907_s17  }
  0x25   : > { %s453_s26 = sshll.u32 %s1910_s23, 4  ;;  %488 = sbr.rel (%p2041_p10) target bundleno = 1406 (0x57e), region = 80  ;;  %s454_s26 = int_to_ptr.vmem [resolvable:$true] %s453_s26 }
  0x26   : > { %1609 = dma.hbm_to_vmem [thread:$0]  (!%p2052_p12), %s452_s1, 256, %s454_s26, [#allocation10], %s1906_s16, %s1906_s16, %s1907_s17  }
  0x2a   : > { %1874 = dma.done.wait (%p1614_p9), [#allocation4], 16  }
  0x2b   : > { %1876 = vsyncadd (%p1614_p9), [#allocation4], 4294967280 }
  0x2c   : > { %1878 = dma.done.wait (%p1614_p9), [#allocation7], 512  }
  0x2d   : > { %1880 = vsyncadd (%p1614_p9), [#allocation7], 4294966784 }
  0x2e   : > { %1882 = dma.done.wait (%p1614_p9), [#allocation10], 256  }
  0x2f   : > { %1884 = vsyncadd (%p1614_p9), [#allocation10], 4294967040  ;;  %p551_p13 = scmp.lt.s32.totalorder %s2013_s22, 1  ;;  %vm559_vm0 = vcmask 261120   ;;  %v1911_v2 = vmov 32.0   ;;  %v1554_v14 = vld [vmem:[%s2449_s3 + $0x8] sm:$0xff] }
  0x30   : > { %1669 = vrcp.f32 %v1911_v2  ;;  %v1556_v15 = vld [vmem:[%s2450_s4 + $0x8] sm:$0xff]  ;;  %v1558_v16 = vld [vmem:[#allocation6 + $0x8] sm:$0xff]  ;;  %623 = vmatpush.bf16.msra.mxu0 %v1554_v14  ;;  %v1553_v17 = vld [vmem:[%s2449_s3] sm:$0xff]  ;;  %s548_s20 = sand.u32 1, %s1895_s19   ;;  %s1550_s23 = sshll.u32 %s2013_s22, 3 }
  0x31   : > { %s552_s1 = scalar_select %p551_p13, %s2013_s22, 1  ;;  %652 = vmatpush.bf16.msra.mxu1 %v1556_v15  ;;  %v1555_v18 = vld [vmem:[%s2450_s4] sm:$0xff]  ;;  %681 = vmatpush.bf16.msra.mxu2 %v1558_v16  ;;  %v1557_v19 = vld [vmem:[#allocation6] sm:$0xff]  ;;  %v691_v21 = vld [vmem:[%s2460_s14 + $0x18] sm:$0xff] }
  0x32   : > { %1572 = vmatpush.msra.mxu3 %v691_v21  ;;  %v1662_v30 = vld [vmem:[#allocation3] ss:$0 sm:$0xff]  ;;  %v1663_v33 = vld [vmem:[%s2448_s2] ss:$0 sm:$0xff]  ;;  %v690_v37 = vld [vmem:[%s2460_s14 + $0x10] sm:$0xff]  ;;  %s1462_s24 = sshll.u32 %s548_s20, 3 }
  0x33   : > { %s1463_s5 = sshll.u32 %s552_s1, 3  ;;  %v689_v38 = vld [vmem:[%s2460_s14 + $0x8] sm:$0xff]  ;;  %v688_v39 = vld [vmem:[%s2460_s14] sm:$0xff]  ;;  %s550_s29 = scalar_lea.vmem [#allocation11], %s1462_s24 }
  0x34   : > { %s554_s18 = scalar_lea.vmem %s2446_s0, %s1463_s5  ;;  %624 = vmatpush.bf16.msra.mxu0 %v1553_v17  ;;  %1574 = vmatpush.msra.mxu3 %v690_v37  ;;  %s2504_s5 = sld [smem:[#allocation25_spill]] }
  0x35   : > { %v2092_v0 = vld [vmem:[%s554_s18] sm:$0xff]  ;;  %653 = vmatpush.bf16.msra.mxu1 %v1555_v18  ;;  %682 = vmatpush.bf16.msra.mxu2 %v1557_v19  ;;  %s2505_s18 = sld [smem:[#allocation26_spill]]  ;;  %s1347_s30 = sshll.u32 %s550_s29, 4  ;;  %s1348_s30 = int_to_ptr.vmem [resolvable:$true] %s1347_s30 }
  0x36   : > { %v560_v1 = vsel %vm559_vm0, %v2092_v0, 0.0  ;;  %v1670_v3 = vpop.eup %1669  ;;  %1576 = vmatpush.msra.mxu3 %v689_v38  ;;  %s1335_s22 = scalar_lea.sflag [#allocation5], %s548_s20 }
  0x37   : > { %561 = vadd.xlane.f32.xlu0 %v560_v1  ;;  %v564_v4 = vmul.f32 32.0, %v1670_v3  ;;  %vm568_vm1 = vweird.f32 %v1670_v3 }
  0x38   : > { %760 = vmatpush.msrb.mxu0 %v691_v21  ;;  %1578 = vmatpush.msra.mxu3 %v688_v39 }
  0x39   : > { %v565_v5 = vsub.f32 1.0, %v564_v4  ;;  %1571 = vmatpush.msrb.mxu1 %v691_v21 }
  0x3a   : > { %761 = vmatpush.msrb.mxu0 %v690_v37 }
  0x3b   : > { %v566_v6 = vmul.f32 %v1670_v3, %v565_v5  ;;  %1573 = vmatpush.msrb.mxu1 %v690_v37  ;;  %s2506_s27 = smov %s2505_s18  ;;  %s1345_s28 = scalar_lea.hbm %s2505_s18, %s1550_s23 }
  0x3c   : > { %762 = vmatpush.msrb.mxu0 %v689_v38  ;;  %s1349_s16 = sshll.u32 %s1345_s28, 4  ;;  %s1849_s24 = scalar_lea.hbm %s2506_s27, 16  ;;  %s1350_s16 = int_to_ptr.hbm [resolvable:$true] %s1349_s16 }
  0x3d   : > { %v567_v7 = vadd.f32 %v1670_v3, %v566_v6  ;;  %1575 = vmatpush.msrb.mxu1 %v689_v38  ;;  %s1843_s17 = sshra.s32 %s1350_s16, 4  ;;  %s1844_s17 = int_to_ptr.hbm [resolvable:$true] %s1843_s17 }
  0x3e   : > { %763 = vmatpush.msrb.mxu0 %v688_v39  ;;  %s1845_s25 = scalar_lea.hbm %s1844_s17, 8  ;;  %p1850_p3 = scmp.lt.s32.totalorder %s1844_s17, %s2506_s27 }
  0x3f   : > { %v2096_v8 = vsel %vm568_vm1, %v1670_v3, %v567_v7  ;;  %1577 = vmatpush.msrb.mxu1 %v688_v39  ;;  %p1846_p0 = scmp.ne.s32.totalorder %s1844_s17, %s1845_s25  ;;  %p1851_p4 = scmp.lt.s32.totalorder %s1849_s24, %s1845_s25 }
  0x41   : > { %p1847_p1 = pnand %p1846_p0, %p2030_p5  ;;  %p1852_p7 = por %p1851_p4, %p1850_p3 }
  0x43   : > { %p1848_p2 = pneg %p1847_p1 }
  0x45   : > { %p1853_p8 = pnand %p1852_p7, %p1848_p2 }
  0xaa   : > { %v562_v9 = vpop.xlane.xlu0 %561 }
  0xab   : > { %v570_v10 = vmul.f32 %v2096_v8, %v562_v9 }
  0xad   : > { %v571_v11 = vsub.f32 %v2092_v0, %v570_v10 }
  0xaf   : > { %v572_v12 = vmul.f32 %v571_v11, %v571_v11 }
  0xb1   : > { %v573_v13 = vsel %vm559_vm0, %v572_v12, 0.0 }
  0xb2   : > { %574 = vadd.xlane.f32.xlu0 %v573_v13 }
 0x125   : > { %v575_v20 = vpop.xlane.xlu0 %574 }
 0x126   : > { %v576_v22 = vmul.f32 %v575_v20, %v2096_v8 }
 0x128   : > { %v577_v23 = vadd.f32 1e-05, %v576_v22 }
 0x12a   : > { %1671 = vrsqrt.f32 %v577_v23  ;;  %vm584_vm3 = vweird.f32 %v577_v23 }
 0x130   : > { %v1672_v24 = vpop.eup %1671 }
 0x131   : > { %v579_v25 = vmul.f32 %v1672_v24, %v577_v23  ;;  %vm585_vm2 = vweird.f32 %v1672_v24 }
 0x132   : > { %vm586_vm4 = vmor %vm584_vm3, %vm585_vm2 }
 0x133   : > { %v580_v26 = vmul.f32 %v1672_v24, %v579_v25 }
 0x135   : > { %v581_v27 = vmul.f32 0.5, %v580_v26 }
 0x137   : > { %v582_v28 = vsub.f32 1.5, %v581_v27 }
 0x139   : > { %v583_v29 = vmul.f32 %v1672_v24, %v582_v28 }
 0x13b   : > { %v587_v31 = vsel %vm586_vm4, %v1672_v24, %v583_v29 }
 0x13c   : > { %v588_v32 = vmul.f32 %v587_v31, %v571_v11 }
 0x13e   : > { %v592_v34 = vmul.f32 %v1662_v30, %v588_v32 }
 0x140   : > { %v596_v35 = vadd.f32 %v1663_v33, %v592_v34 }
 0x142   : > { %v597_v36 = vpack.c.bf16 %v596_v35, %v596_v35 }
 0x144   : > { %1472 = vmatmul.msk.bf16.vlgmr.msra.gmra.mxu0 %vm559_vm0, %v597_v36  ;;  %1481 = vmatmul.msk.bf16.vlgmr.msra.gmra.mxu1 %vm559_vm0, %v597_v36 }
 0x145   : > { %1490 = vmatmul.msk.bf16.vlgmr.msra.gmra.mxu2 %vm559_vm0, %v597_v36 }
 0x1c1   : > { %v626_v40 = vpop.f32.mrf.mxu0  ;;  %v655_v41 = vpop.f32.mrf.mxu1 }
 0x1c2   : > { %v700_v42 = vperm.slane %v626_v40, 0  ;;  %v693_v43 = vrot.slane %v626_v40, 1  ;;  %v694_v44 = vrot.slane %v626_v40, 2  ;;  %v695_v50 = vrot.slane %v626_v40, 3 }
 0x1c3   : > { %v696_v56 = vrot.slane %v626_v40, 4  ;;  %v697_v60 = vrot.slane %v626_v40, 5  ;;  %v698_v63 = vrot.slane %v626_v40, 6  ;;  %v699_v3 = vrot.slane %v626_v40, 7 }
 0x1c4   : > { %v716_v45 = vmul.f32 %v700_v42, %v655_v41  ;;  %v701_v46 = vperm.slane %v693_v43, 0  ;;  %v702_v47 = vperm.slane %v694_v44, 0  ;;  %v703_v54 = vperm.slane %v695_v50, 0 }
 0x1c5   : > { %v704_v58 = vperm.slane %v696_v56, 0  ;;  %v705_v61 = vperm.slane %v697_v60, 0  ;;  %v706_v1 = vperm.slane %v698_v63, 0  ;;  %v707_v4 = vperm.slane %v699_v3, 0 }
 0x1c6   : > { %1491 = vmatmul.msk.f32.vlgmr.msrb.gmra.mxu0 %vm559_vm0, %v716_v45  ;;  %v717_v48 = vmul.f32 %v701_v46, %v655_v41  ;;  %v718_v49 = vmul.f32 %v702_v47, %v655_v41  ;;  %v719_v55 = vmul.f32 %v703_v54, %v655_v41 }
 0x1c7   : > { %v720_v59 = vmul.f32 %v704_v58, %v655_v41  ;;  %v721_v62 = vmul.f32 %v705_v61, %v655_v41  ;;  %v722_v2 = vmul.f32 %v706_v1, %v655_v41  ;;  %v723_v5 = vmul.f32 %v707_v4, %v655_v41 }
 0x1c8   : > { %v2133_v51 = vpop.f32.mrf.mxu2  ;;  %1492 = vmatmul.msk.f32.vlgmr.msrb.gmra.mxu1 %vm559_vm0, %v717_v48  ;;  %1493 = vmatmul.msk.f32.vlgmr.msra.gmra.mxu3 %vm559_vm0, %v718_v49 }
 0x1c9   : > { %v628_v52 = vpop.f32.mrf.mxu0  ;;  %v657_v53 = vpop.f32.mrf.mxu1 }
 0x1d0   : > { %v686_v57 = vpop.f32.mrf.mxu2  ;;  %1494 = vmatmul.msk.f32.gmra.mxu3 %vm559_vm0, %v719_v55 }
 0x1d8   : > { %1495 = vmatmul.msk.f32.gmra.mxu3 %vm559_vm0, %v720_v59 }
 0x1e0   : > { %1496 = vmatmul.msk.f32.gmra.mxu3 %vm559_vm0, %v721_v62 }
 0x1e8   : > { %1497 = vmatmul.msk.f32.gmra.mxu3 %vm559_vm0, %v722_v2 }
 0x1f0   : > { %1498 = vmatmul.msk.f32.gmra.mxu3 %vm559_vm0, %v723_v5 }
 0x243   : > { %v765_v6 = vpop.f32.mrf.mxu0 }
 0x244   : > { %v789_v7 = vsel %vm559_vm0, %v765_v6, -inf }
 0x245   : > { %v790_v9 = vrot.slane %v789_v7, 4  ;;  %v768_v10 = vpop.f32.mrf.mxu1 }
 0x246   : > { %v796_v11 = vsel %vm559_vm0, %v768_v10, -inf }
 0x247   : > { %v791_v12 = vmax.f32 %v789_v7, %v790_v9  ;;  %v797_v13 = vrot.slane %v796_v11, 4 }
 0x249   : > { %v792_v14 = vrot.slane %v791_v12, 2  ;;  %v798_v15 = vmax.f32 %v796_v11, %v797_v13 }
 0x24b   : > { %v793_v16 = vmax.f32 %v791_v12, %v792_v14  ;;  %v799_v17 = vrot.slane %v798_v15, 2  ;;  %v771_v18 = vpop.f32.mrf.mxu3 }
 0x24c   : > { %v803_v19 = vsel %vm559_vm0, %v771_v18, -inf }
 0x24d   : > { %v794_v20 = vrot.slane %v793_v16, 1  ;;  %v804_v21 = vrot.slane %v803_v19, 4  ;;  %v800_v22 = vmax.f32 %v798_v15, %v799_v17 }
 0x24f   : > { %v805_v23 = vmax.f32 %v803_v19, %v804_v21  ;;  %v795_v24 = vmax.f32 %v793_v16, %v794_v20  ;;  %v801_v26 = vrot.slane %v800_v22, 1 }
 0x251   : > { %v806_v25 = vrot.slane %v805_v23, 2  ;;  %v845_v30 = vsub.f32 %v765_v6, %v795_v24  ;;  %v802_v32 = vmax.f32 %v800_v22, %v801_v26 }
 0x253   : > { %v807_v27 = vmax.f32 %v805_v23, %v806_v25  ;;  %v774_v28 = vpop.f32.mrf.mxu3  ;;  %v853_v35 = vmul.f32 1.442695, %v845_v30  ;;  %v846_v37 = vsub.f32 %v768_v10, %v802_v32 }
 0x254   : > { %v810_v29 = vsel %vm559_vm0, %v774_v28, -inf }
 0x255   : > { %v811_v31 = vrot.slane %v810_v29, 4  ;;  %v808_v33 = vrot.slane %v807_v27, 1  ;;  %1673 = vpow2.f32 %v853_v35  ;;  %v855_v44 = vmul.f32 1.442695, %v846_v37 }
 0x257   : > { %v812_v34 = vmax.f32 %v810_v29, %v811_v31  ;;  %v809_v38 = vmax.f32 %v807_v27, %v808_v33  ;;  %1675 = vpow2.f32 %v855_v44 }
 0x259   : > { %v813_v36 = vrot.slane %v812_v34, 2  ;;  %v847_v45 = vsub.f32 %v771_v18, %v809_v38 }
 0x25b   : > { %v814_v39 = vmax.f32 %v812_v34, %v813_v36  ;;  %v777_v40 = vpop.f32.mrf.mxu3  ;;  %v857_v50 = vmul.f32 1.442695, %v847_v45  ;;  %v2147_v52 = vpop.eup %1673 }
 0x25c   : > { %v817_v41 = vsel %vm559_vm0, %v777_v40, -inf  ;;  %v869_v57 = vsel %vm559_vm0, %v2147_v52, 0.0 }
 0x25d   : > { %v815_v42 = vrot.slane %v814_v39, 1  ;;  %v818_v43 = vrot.slane %v817_v41, 4  ;;  %1677 = vpow2.f32 %v857_v50  ;;  %v2152_v60 = vpop.eup %1675  ;;  %v870_v63 = vrot.slane %v869_v57, 4 }
 0x25e   : > { %v876_v3 = vsel %vm559_vm0, %v2152_v60, 0.0 }
 0x25f   : > { %v816_v46 = vmax.f32 %v814_v39, %v815_v42  ;;  %v819_v47 = vmax.f32 %v817_v41, %v818_v43  ;;  %v871_v7 = vadd.f32 %v870_v63, %v869_v57  ;;  %v877_v10 = vrot.slane %v876_v3, 4 }
 0x261   : > { %v848_v48 = vsub.f32 %v774_v28, %v816_v46  ;;  %v820_v49 = vrot.slane %v819_v47, 2  ;;  %v872_v16 = vrot.slane %v871_v7, 2  ;;  %v878_v17 = vadd.f32 %v877_v10, %v876_v3 }
 0x263   : > { %v859_v53 = vmul.f32 1.442695, %v848_v48  ;;  %v821_v54 = vmax.f32 %v819_v47, %v820_v49  ;;  %v780_v55 = vpop.f32.mrf.mxu3  ;;  %v2156_v4 = vpop.eup %1677  ;;  %v873_v23 = vadd.f32 %v872_v16, %v871_v7  ;;  %v879_v25 = vrot.slane %v878_v17, 2 }
 0x264   : > { %v824_v56 = vsel %vm559_vm0, %v780_v55, -inf  ;;  %v883_v12 = vsel %vm559_vm0, %v2156_v4, 0.0 }
 0x265   : > { %v822_v58 = vrot.slane %v821_v54, 1  ;;  %v825_v59 = vrot.slane %v824_v56, 4  ;;  %1679 = vpow2.f32 %v859_v53  ;;  %v884_v18 = vrot.slane %v883_v12, 4 }
 0x266   : > { %v874_v32 = vrot.slane %v873_v23, 1  ;;  %v880_v34 = vadd.f32 %v879_v25, %v878_v17 }
 0x267   : > { %v823_v61 = vmax.f32 %v821_v54, %v822_v58  ;;  %v826_v62 = vmax.f32 %v824_v56, %v825_v59  ;;  %v885_v26 = vadd.f32 %v884_v18, %v883_v12 }
 0x268   : > { %v2172_v39 = vadd.f32 %v874_v32, %v873_v23 }
 0x269   : > { %v849_v1 = vsub.f32 %v777_v40, %v823_v61  ;;  %v827_v2 = vrot.slane %v826_v62, 2  ;;  %v886_v35 = vrot.slane %v885_v26, 2  ;;  %v881_v40 = vrot.slane %v880_v34, 1 }
 0x26a   : > { %vm930_vm5 = vweird.f32 %v2172_v39 }
 0x26b   : > { %v2158_v5 = vpop.f32.mrf.mxu3  ;;  %v2160_v6 = vpop.eup %1679  ;;  %v861_v9 = vmul.f32 1.442695, %v849_v1  ;;  %v828_v11 = vmax.f32 %v826_v62, %v827_v2  ;;  %v887_v41 = vadd.f32 %v886_v35, %v885_v26  ;;  %v2181_v49 = vadd.f32 %v881_v40, %v880_v34 }
 0x26c   : > { %v831_v13 = vsel %vm559_vm0, %v2158_v5, -inf  ;;  %v890_v14 = vsel %vm559_vm0, %v2160_v6, 0.0 }
 0x26d   : > { %1681 = vpow2.f32 %v861_v9  ;;  %v829_v15 = vrot.slane %v828_v11, 1  ;;  %v832_v20 = vrot.slane %v831_v13, 4  ;;  %v891_v21 = vrot.slane %v890_v14, 4 }
 0x26e   : > { %v888_v50 = vrot.slane %v887_v41, 1  ;;  %vm944_vm10 = vweird.f32 %v2181_v49 }
 0x26f   : > { %v830_v19 = vmax.f32 %v828_v11, %v829_v15  ;;  %v833_v28 = vmax.f32 %v831_v13, %v832_v20  ;;  %v892_v29 = vadd.f32 %v891_v21, %v890_v14  ;;  %v934_v21 = vand.u32 2147483647, %v2172_v39 }
 0x270   : > { %v2186_v58 = vadd.f32 %v888_v50, %v887_v41 }
 0x271   : > { %v850_v24 = vsub.f32 %v780_v55, %v830_v19  ;;  %v834_v36 = vrot.slane %v833_v28, 2  ;;  %v893_v37 = vrot.slane %v892_v29, 2  ;;  %vm2227_vm6 = vcmp.eq.f32.partialorder %v934_v21, 8.507059e+37 }
 0x272   : > { %vm958_vm12 = vweird.f32 %v2186_v58 }
 0x273   : > { %v2168_v22 = vpop.eup %1681  ;;  %v863_v31 = vmul.f32 1.442695, %v850_v24  ;;  %v835_v42 = vmax.f32 %v833_v28, %v834_v36  ;;  %v894_v43 = vadd.f32 %v893_v37, %v892_v29  ;;  %v2176_v46 = vpop.f32.mrf.mxu3 }
 0x274   : > { %v897_v27 = vsel %vm559_vm0, %v2168_v22, 0.0  ;;  %v838_v55 = vsel %vm559_vm0, %v2176_v46, -inf }
 0x275   : > { %v898_v30 = vrot.slane %v897_v27, 4  ;;  %1683 = vpow2.f32 %v863_v31  ;;  %v836_v48 = vrot.slane %v835_v42, 1  ;;  %v895_v53 = vrot.slane %v894_v43, 1 }
 0x276   : > { %1685 = vrcp.f32 %v2172_v39  ;;  %v839_v59 = vrot.slane %v838_v55, 4 }
 0x277   : > { %v899_v33 = vadd.f32 %v898_v30, %v897_v27  ;;  %v837_v57 = vmax.f32 %v835_v42, %v836_v48  ;;  %1687 = vrcp.f32 %v2181_v49  ;;  %v2188_v61 = vadd.f32 %v895_v53, %v894_v43 }
 0x278   : > { %1689 = vrcp.f32 %v2186_v58  ;;  %v840_v7 = vmax.f32 %v838_v55, %v839_v59  ;;  %v936_v30 = vand.u32 2147483648, %v2172_v39  ;;  %v962_v55 = vand.u32 2147483647, %v2186_v58 }
 0x279   : > { %v900_v38 = vrot.slane %v899_v33, 2  ;;  %v851_v3 = vsub.f32 %v2158_v5, %v837_v57  ;;  %1691 = vrcp.f32 %v2188_v61  ;;  %vm972_vm4 = vweird.f32 %v2188_v61 }
 0x27a   : > { %v841_v14 = vrot.slane %v840_v7, 2  ;;  %vm2263_vm13 = vcmp.eq.f32.partialorder %v962_v55, 8.507059e+37 }
 0x27b   : > { %v2174_v44 = vpop.eup %1683  ;;  %v901_v45 = vadd.f32 %v900_v38, %v899_v33  ;;  %v865_v11 = vmul.f32 1.442695, %v851_v3 }
 0x27c   : > { %v904_v47 = vsel %vm559_vm0, %v2174_v44, 0.0  ;;  %v2190_v63 = vpop.eup %1685  ;;  %v842_v17 = vmax.f32 %v840_v7, %v841_v14 }
 0x27d   : > { %v905_v54 = vrot.slane %v904_v47, 4  ;;  %v902_v56 = vrot.slane %v901_v45, 1  ;;  %v926_v9 = vmul.f32 %v2190_v63, %v2172_v39  ;;  %v2199_v12 = vpop.eup %1687  ;;  %vm931_vm7 = vweird.f32 %v2190_v63 }
 0x27e   : > { %v940_v5 = vmul.f32 %v2199_v12, %v2181_v49  ;;  %v2206_v18 = vpop.eup %1689  ;;  %v843_v26 = vrot.slane %v842_v17, 1  ;;  %vm2242_vm8 = vmor %vm930_vm5, %vm931_vm7  ;;  %vm945_vm9 = vweird.f32 %v2199_v12 }
 0x27f   : > { %v906_v62 = vadd.f32 %v905_v54, %v904_v47  ;;  %v2192_v1 = vadd.f32 %v902_v56, %v901_v45  ;;  %v927_v15 = vsub.f32 1.0, %v926_v9  ;;  %v2208_v19 = vpop.eup %1691  ;;  %v954_v27 = vmul.f32 %v2206_v18, %v2186_v58  ;;  %vm2271_vm14 = vmor %vm944_vm10, %vm945_vm9 }
 0x280   : > { %v941_v25 = vsub.f32 1.0, %v940_v5  ;;  %v968_v28 = vmul.f32 %v2208_v19, %v2188_v61  ;;  %v844_v34 = vmax.f32 %v842_v17, %v843_v26  ;;  %v937_v45 = vor.u32 1.1754944e-38, %v936_v30 }
 0x281   : > { %v907_v2 = vrot.slane %v906_v62, 2  ;;  %1693 = vrcp.f32 %v2192_v1  ;;  %v928_v24 = vmul.f32 %v2190_v63, %v927_v15  ;;  %v955_v40 = vsub.f32 1.0, %v954_v27 }
 0x282   : > { %1695 = vpow2.f32 %v865_v11  ;;  %v942_v37 = vmul.f32 %v2199_v12, %v941_v25  ;;  %v969_v41 = vsub.f32 1.0, %v968_v28  ;;  %v852_v43 = vsub.f32 %v2176_v46, %v844_v34 }
 0x283   : > { %v908_v10 = vadd.f32 %v907_v2, %v906_v62  ;;  %v929_v36 = vadd.f32 %v2190_v63, %v928_v24  ;;  %v948_v47 = vand.u32 2147483647, %v2181_v49  ;;  %v950_v54 = vand.u32 2147483648, %v2181_v49 }
 0x284   : > { %v964_v56 = vand.u32 2147483648, %v2186_v58  ;;  %v867_v57 = vmul.f32 1.442695, %v852_v43  ;;  %v943_v39 = vadd.f32 %v2199_v12, %v942_v37  ;;  %v956_v2 = vmul.f32 %v2206_v18, %v955_v40 }
 0x285   : > { %v909_v13 = vrot.slane %v908_v10, 1  ;;  %v933_v46 = vsel %vm2242_vm8, %v2190_v63, %v929_v36  ;;  %v970_v3 = vmul.f32 %v2208_v19, %v969_v41  ;;  %vm2257_vm11 = vcmp.eq.f32.partialorder %v948_v47, 8.507059e+37 }
 0x286   : > { %v938_v14 = vsel %vm2227_vm6, %v937_v45, %v933_v46  ;;  %vm959_vm15 = vweird.f32 %v2206_v18  ;;  %v947_v17 = vsel %vm2271_vm14, %v2199_v12, %v943_v39  ;;  %v957_v21 = vadd.f32 %v2206_v18, %v956_v2 }
 0x287   : > { %v2204_v16 = vadd.f32 %v909_v13, %v908_v10  ;;  %v2211_v20 = vpop.eup %1693  ;;  %v951_v10 = vor.u32 1.1754944e-38, %v950_v54  ;;  %v965_v13 = vor.u32 1.1754944e-38, %v964_v56  ;;  %v971_v24 = vadd.f32 %v2208_v19, %v970_v3  ;;  %vm2293_vm3 = vmor %vm958_vm12, %vm959_vm15 }
 0x288   : > { %v2214_v23 = vpop.eup %1695  ;;  %v982_v31 = vmul.f32 %v2211_v20, %v2192_v1  ;;  %vm973_vm1 = vweird.f32 %v2208_v19  ;;  %v978_v25 = vand.u32 2147483648, %v2188_v61  ;;  %vm987_vm2 = vweird.f32 %v2211_v20 }
 0x289   : > { %1697 = vrcp.f32 %v2204_v16  ;;  %v911_v29 = vsel %vm559_vm0, %v2214_v23, 0.0  ;;  %v976_v28 = vand.u32 2147483647, %v2188_v61  ;;  %vm986_vm5 = vweird.f32 %v2192_v1  ;;  %vm2301_vm6 = vmor %vm972_vm4, %vm973_vm1 }
 0x28a   : > { %v912_v32 = vrot.slane %v911_v29, 4  ;;  %v983_v48 = vsub.f32 1.0, %v982_v31  ;;  %1699 = vpow2.f32 %v867_v57  ;;  %v990_v31 = vand.u32 2147483647, %v2192_v1  ;;  %vm2318_vm8 = vmor %vm986_vm5, %vm987_vm2 }
 0x28b   : > { %v961_v61 = vsel %vm2293_vm3, %v2206_v18, %v957_v21  ;;  %v975_v33 = vsel %vm2301_vm6, %v2208_v19, %v971_v24  ;;  %v979_v37 = vor.u32 1.1754944e-38, %v978_v25  ;;  %vm1000_vm9 = vweird.f32 %v2204_v16  ;;  %v1560_v21 = vld [vmem:[#allocation8 + $0x8] sm:$0xff] }
 0x28c   : > { %v913_v38 = vadd.f32 %v912_v32, %v911_v29  ;;  %v984_v9 = vmul.f32 %v2211_v20, %v983_v48  ;;  %v992_v29 = vand.u32 2147483648, %v2192_v1  ;;  %v1006_v1 = vand.u32 2147483648, %v2204_v16  ;;  %1164 = vmatpush.bf16.msra.mxu0 %v1560_v21 }
 0x28d   : > { %v1004_v18 = vand.u32 2147483647, %v2204_v16  ;;  %v952_v19 = vsel %vm2257_vm11, %v951_v10, %v947_v17  ;;  %vm977_vm10 = vcmp.eq.f32.partialorder %v976_v28, 8.507059e+37  ;;  %v966_v43 = vsel %vm2263_vm13, %v965_v13, %v961_v61 }
 0x28e   : > { %v914_v50 = vrot.slane %v913_v38, 2  ;;  %v985_v26 = vadd.f32 %v2211_v20, %v984_v9  ;;  %v993_v40 = vor.u32 1.1754944e-38, %v992_v29  ;;  %v980_v45 = vsel %vm977_vm10, %v979_v37, %v975_v33  ;;  %v1559_v29 = vld [vmem:[#allocation8] sm:$0xff] }
 0x28f   : > { %v2231_v35 = vpop.eup %1697  ;;  %vm991_vm14 = vcmp.eq.f32.partialorder %v990_v31, 8.507059e+37  ;;  %v1007_v48 = vor.u32 1.1754944e-38, %v1006_v1  ;;  %v1038_v53 = vmul.f32 %v2152_v60, %v952_v19  ;;  %vm1005_vm11 = vcmp.eq.f32.partialorder %v1004_v18, 8.507059e+37 }
 0x290   : > { %v996_v42 = vmul.f32 %v2231_v35, %v2204_v16  ;;  %v915_v62 = vadd.f32 %v914_v50, %v913_v38  ;;  %v2289_v27 = vpop.eup %1699  ;;  %vm1001_vm7 = vweird.f32 %v2231_v35  ;;  %v989_v38 = vsel %vm2318_vm8, %v2211_v20, %v985_v26  ;;  %1165 = vmatpush.bf16.msra.mxu0 %v1559_v29 }
 0x291   : > { %v918_v32 = vsel %vm559_vm0, %v2289_v27, 0.0  ;;  %vm1002_vm12 = vmor %vm1000_vm9, %vm1001_vm7  ;;  %v994_v20 = vsel %vm991_vm14, %v993_v40, %v989_v38  ;;  %v1039_v54 = vmul.f32 %v2156_v4, %v966_v43  ;;  %v1037_v46 = vmul.f32 %v2147_v52, %v938_v14 }
 0x292   : > { %v997_v59 = vsub.f32 1.0, %v996_v42  ;;  %v916_v63 = vrot.slane %v915_v62, 1  ;;  %v919_v36 = vrot.slane %v918_v32, 4  ;;  %v1046_v60 = vmul.f32 %v1038_v53, %v2133_v51 }
 0x293   : > { %v1047_v7 = vmul.f32 %v1039_v54, %v2133_v51  ;;  %vm1117_vm7 = vcmask 1041409   ;;  %vm1119_vm8 = vcmask 1042434   ;;  %vm1121_vm9 = vcmask 1043459  }
 0x294   : > { %v998_v15 = vmul.f32 %v2231_v35, %v997_v59  ;;  %v2277_v5 = vadd.f32 %v916_v63, %v915_v62  ;;  %v920_v41 = vadd.f32 %v919_v36, %v918_v32  ;;  %v1040_v59 = vmul.f32 %v2160_v6, %v980_v45 }
 0x295   : > { %v1041_v62 = vmul.f32 %v2168_v22, %v994_v20  ;;  %v1045_v6 = vmul.f32 %v1037_v46, %v2133_v51  ;;  %v1060_v13 = vsel %vm559_vm0, %v1046_v60, 0.0  ;;  %v1067_v49 = vsel %vm559_vm0, %v1047_v7, 0.0 }
 0x296   : > { %1701 = vrcp.f32 %v2277_v5  ;;  %v999_v58 = vadd.f32 %v2231_v35, %v998_v15  ;;  %v921_v16 = vrot.slane %v920_v41, 2  ;;  %v1018_v2 = vand.u32 2147483647, %v2277_v5 }
 0x297   : > { %vm1014_vm15 = vweird.f32 %v2277_v5  ;;  %v1048_v22 = vmul.f32 %v1040_v59, %v2133_v51  ;;  %v1049_v10 = vmul.f32 %v1041_v62, %v2133_v51  ;;  %v1061_v24 = vrot.slane %v1060_v13, 4 }
 0x298   : > { %v1003_v47 = vsel %vm1002_vm12, %v2231_v35, %v999_v58  ;;  %v922_v57 = vadd.f32 %v921_v16, %v920_v41  ;;  %v1020_v35 = vand.u32 2147483648, %v2277_v5  ;;  %vm1019_vm2 = vcmp.eq.f32.partialorder %v1018_v2, 8.507059e+37 }
 0x299   : > { %v1008_v55 = vsel %vm1005_vm11, %v1007_v48, %v1003_v47  ;;  %v1074_v17 = vsel %vm559_vm0, %v1048_v22, 0.0  ;;  %v1081_v25 = vsel %vm559_vm0, %v1049_v10, 0.0  ;;  %v1068_v12 = vrot.slane %v1067_v49, 4 }
 0x29a   : > { %v923_v3 = vrot.slane %v922_v57, 1  ;;  %v1042_v4 = vmul.f32 %v2174_v44, %v1008_v55  ;;  %v1021_v63 = vor.u32 1.1754944e-38, %v1020_v35  ;;  %v1075_v58 = vrot.slane %v1074_v17, 4 }
 0x29b   : > { %v1082_v32 = vrot.slane %v1081_v25, 4  ;;  %v1062_v33 = vadd.f32 %v1061_v24, %v1060_v13  ;;  %v1069_v1 = vadd.f32 %v1068_v12, %v1067_v49  ;;  %vm1123_vm10 = vcmask 1044484  }
 0x29c   : > { %v1702_v42 = vpop.eup %1701  ;;  %v924_v52 = vadd.f32 %v923_v3, %v922_v57  ;;  %v1050_v44 = vmul.f32 %v1042_v4, %v2133_v51  ;;  %v1076_v18 = vadd.f32 %v1075_v58, %v1074_v17  ;;  %vm1125_vm12 = vcmask 1045509  }
 0x29d   : > { %v1010_v50 = vmul.f32 %v1702_v42, %v2277_v5  ;;  %vm1015_vm13 = vweird.f32 %v1702_v42  ;;  %v1053_v5 = vsel %vm559_vm0, %v1045_v6, 0.0  ;;  %v1083_v40 = vadd.f32 %v1082_v32, %v1081_v25 }
 0x29e   : > { %vm1016_vm1 = vmor %vm1014_vm15, %vm1015_vm13  ;;  %1703 = vrcp.f32 %v924_v52  ;;  %v1088_v28 = vsel %vm559_vm0, %v1050_v44, 0.0  ;;  %v1054_v31 = vrot.slane %v1053_v5, 4  ;;  %v1034_v19 = vand.u32 2147483648, %v924_v52 }
 0x29f   : > { %v1011_v56 = vsub.f32 1.0, %v1010_v50  ;;  %v1089_v34 = vrot.slane %v1088_v28, 4  ;;  %v1063_v43 = vrot.slane %v1062_v33, 2  ;;  %v1070_v47 = vrot.slane %v1069_v1, 2 }
 0x2a0   : > { %v1055_v38 = vadd.f32 %v1054_v31, %v1053_v5  ;;  %vm1028_vm4 = vweird.f32 %v924_v52  ;;  %v1077_v16 = vrot.slane %v1076_v18, 2  ;;  %v1035_v53 = vor.u32 1.1754944e-38, %v1034_v19 }
 0x2a1   : > { %v1012_v39 = vmul.f32 %v1702_v42, %v1011_v56  ;;  %v1090_v45 = vadd.f32 %v1089_v34, %v1088_v28  ;;  %v1084_v54 = vrot.slane %v1083_v40, 2  ;;  %v1064_v56 = vadd.f32 %v1063_v43, %v1062_v33  ;;  %v1664_v34 = vld [vmem:[%s2453_s7] ss:$0 sm:$0xff] }
 0x2a2   : > { %v1056_v50 = vrot.slane %v1055_v38, 2  ;;  %v1071_v59 = vadd.f32 %v1070_v47, %v1069_v1  ;;  %v1078_v2 = vadd.f32 %v1077_v16, %v1076_v18  ;;  %vm1127_vm14 = vcmask 1046534   ;;  %v1561_v47 = vld [vmem:[#allocation9] sm:$0xff] }
 0x2a3   : > { %v1013_v9 = vadd.f32 %v1702_v42, %v1012_v39  ;;  %v1091_v57 = vrot.slane %v1090_v45, 2  ;;  %v1085_v3 = vadd.f32 %v1084_v54, %v1083_v40  ;;  %v1065_v4 = vrot.slane %v1064_v56, 1 }
 0x2a4   : > { %v1704_v30 = vpop.eup %1703  ;;  %v1057_v39 = vadd.f32 %v1056_v50, %v1055_v38  ;;  %vm1129_vm11 = vcmask 1047559   ;;  %v1569_v50 = vld [vmem:[%s2458_s12 + $0x30] sm:$0xff] }
 0x2a5   : > { %v1017_v11 = vsel %vm1016_vm1, %v1702_v42, %v1013_v9  ;;  %v1024_v61 = vmul.f32 %v1704_v30, %v924_v52  ;;  %vm1029_vm3 = vweird.f32 %v1704_v30  ;;  %v1032_v42 = vand.u32 2147483647, %v924_v52 }
 0x2a6   : > { %v1022_v14 = vsel %vm1019_vm2, %v1021_v63, %v1017_v11  ;;  %vm1030_vm5 = vmor %vm1028_vm4, %vm1029_vm3  ;;  %v1092_v7 = vadd.f32 %v1091_v57, %v1090_v45  ;;  %v1072_v9 = vrot.slane %v1071_v59, 1  ;;  %v1058_v22 = vrot.slane %v1057_v39, 1  ;;  %v1562_v45 = vld [vmem:[#allocation9 + $0x8] sm:$0xff] }
 0x2a7   : > { %v1043_v15 = vmul.f32 %v2214_v23, %v1022_v14  ;;  %v1025_v37 = vsub.f32 1.0, %v1024_v61  ;;  %vm1033_vm6 = vcmp.eq.f32.partialorder %v1032_v42, 8.507059e+37  ;;  %v1079_v63 = vrot.slane %v1078_v2, 1  ;;  %1234 = vmatpush.bf16.msra.mxu1 %v1562_v45 }
 0x2a8   : > { %v1086_v11 = vrot.slane %v1085_v3, 1  ;;  %v1066_v13 = vadd.f32 %v1065_v4, %v1064_v56  ;;  %v1093_v44 = vrot.slane %v1092_v7, 1  ;;  %v1567_v4 = vld [vmem:[%s2458_s12 + $0x20] sm:$0xff] }
 0x2a9   : > { %v1051_v26 = vmul.f32 %v1043_v15, %v2133_v51  ;;  %v1026_v41 = vmul.f32 %v1704_v30, %v1025_v37  ;;  %v1059_v15 = vadd.f32 %v1058_v22, %v1057_v39  ;;  %v1080_v5 = vadd.f32 %v1079_v63, %v1078_v2  ;;  %v1667_v22 = vld [vmem:[%s2457_s11] ss:$0 sm:$0xff] }
 0x2aa   : > { %v1087_v17 = vadd.f32 %v1086_v11, %v1085_v3  ;;  %v1094_v24 = vadd.f32 %v1093_v44, %v1092_v7  ;;  %v1566_v7 = vld [vmem:[%s2458_s12 + $0x18] sm:$0xff] }
 0x2ab   : > { %v1095_v23 = vsel %vm559_vm0, %v1051_v26, 0.0  ;;  %v1027_v48 = vadd.f32 %v1704_v30, %v1026_v41  ;;  %v1118_v21 = vsel %vm1117_vm7, %v1066_v13, %v1059_v15  ;;  %1235 = vmatpush.bf16.msra.mxu1 %v1561_v47 }
 0x2ac   : > { %v1096_v36 = vrot.slane %v1095_v23, 4 }
 0x2ad   : > { %v1031_v55 = vsel %vm1030_vm5, %v1704_v30, %v1027_v48 }
 0x2ae   : > { %v1097_v20 = vadd.f32 %v1096_v36, %v1095_v23  ;;  %v1036_v46 = vsel %vm1033_vm6, %v1035_v53, %v1031_v55 }
 0x2af   : > { %v1044_v35 = vmul.f32 %v2289_v27, %v1036_v46  ;;  %v1073_v27 = vadd.f32 %v1072_v9, %v1071_v59  ;;  %v1565_v9 = vld [vmem:[%s2458_s12 + $0x10] sm:$0xff] }
 0x2b0   : > { %v1098_v62 = vrot.slane %v1097_v20, 2 }
 0x2b1   : > { %v1052_v60 = vmul.f32 %v1044_v35, %v2133_v51  ;;  %v1120_v26 = vsel %vm1119_vm8, %v1073_v27, %v1118_v21  ;;  %v1666_v35 = vld [vmem:[%s2455_s9] ss:$0 sm:$0xff] }
 0x2b2   : > { %v1099_v52 = vadd.f32 %v1098_v62, %v1097_v20  ;;  %v1122_v28 = vsel %vm1121_vm9, %v1080_v5, %v1120_v26 }
 0x2b3   : > { %v1102_v6 = vsel %vm559_vm0, %v1052_v60, 0.0  ;;  %v1124_v30 = vsel %vm1123_vm10, %v1087_v17, %v1122_v28  ;;  %v1568_v60 = vld [vmem:[%s2458_s12 + $0x28] sm:$0xff] }
 0x2b4   : > { %v1103_v10 = vrot.slane %v1102_v6, 4  ;;  %v1100_v49 = vrot.slane %v1099_v52, 1  ;;  %v1126_v31 = vsel %vm1125_vm12, %v1094_v24, %v1124_v30  ;;  %v1668_v24 = vld [vmem:[%s2504_s5] ss:$0 sm:$0xff] }
 0x2b6   : > { %v1104_v14 = vadd.f32 %v1103_v10, %v1102_v6  ;;  %v1101_v12 = vadd.f32 %v1100_v49, %v1099_v52  ;;  %v1564_v52 = vld [vmem:[%s2458_s12 + $0x8] sm:$0xff]  ;;  %v1563_v6 = vld [vmem:[%s2458_s12] sm:$0xff] }
 0x2b8   : > { %v1105_v51 = vrot.slane %v1104_v14, 2  ;;  %v1128_v23 = vsel %vm1127_vm14, %v1101_v12, %v1126_v31 }
 0x2ba   : > { %v1106_v25 = vadd.f32 %v1105_v51, %v1104_v14 }
 0x2bc   : > { %v1107_v29 = vrot.slane %v1106_v25, 1 }
 0x2be   : > { %v1108_v58 = vadd.f32 %v1107_v29, %v1106_v25 }
 0x2c0   : > { %v1130_v32 = vsel %vm1129_vm11, %v1108_v58, %v1128_v23 }
 0x2c1   : > { %1132 = vst.msk [vmem:[#allocation2] sm:$0xff] %vm559_vm0, %v1130_v32 }
 0x2c8   : > { %v1133_v61 = vld [vmem:[#allocation2] sm:$0xff] }
 0x2c9   : > { %v1134_v33 = vpack.c.bf16 %v1133_v61, %v1133_v61 }
 0x2cb   : > { %1507 = vmatmul.msk.bf16.vlgmr.msra.gmra.mxu0 %vm559_vm0, %v1134_v33 }
 0x348   : > { %v1167_v1 = vpop.f32.mrf.mxu0 }
 0x349   : > { %v1168_v36 = vadd.f32 %v1664_v34, %v1167_v1 }
 0x34b   : > { %v2367_v37 = vadd.f32 %v1168_v36, %v2092_v0  ;;  %v1570_v0 = vld [vmem:[%s2458_s12 + $0x38] sm:$0xff] }
 0x34c   : > { %1319 = vmatpush.bf16.msrb.mxu2 %v1570_v0 }
 0x34d   : > { %v1174_v38 = vsel %vm559_vm0, %v2367_v37, 0.0 }
 0x34e   : > { %1175 = vadd.xlane.f32.xlu1 %v1174_v38 }
 0x350   : > { %v1169_v18 = vpop.f32.mrf.mxu0  ;;  %1320 = vmatpush.bf16.msrb.mxu2 %v1569_v50 }
 0x354   : > { %1321 = vmatpush.bf16.msrb.mxu2 %v1568_v60 }
 0x358   : > { %1322 = vmatpush.bf16.msrb.mxu2 %v1567_v4 }
 0x35c   : > { %1323 = vmatpush.bf16.msrb.mxu2 %v1566_v7 }
 0x360   : > { %1324 = vmatpush.bf16.msrb.mxu2 %v1565_v9 }
 0x364   : > { %1325 = vmatpush.bf16.msrb.mxu2 %v1564_v52 }
 0x368   : > { %1326 = vmatpush.bf16.msrb.mxu2 %v1563_v6 }
 0x3c1   : > { %v1176_v19 = vpop.xlane.xlu1 %1175 }
 0x3c2   : > { %v1177_v40 = vmul.f32 %v1176_v19, %v2096_v8 }
 0x3c4   : > { %v1178_v41 = vsub.f32 %v2367_v37, %v1177_v40 }
 0x3c6   : > { %v1179_v42 = vmul.f32 %v1178_v41, %v1178_v41 }
 0x3c8   : > { %v1180_v43 = vsel %vm559_vm0, %v1179_v42, 0.0 }
 0x3c9   : > { %1181 = vadd.xlane.f32.xlu1 %v1180_v43 }
 0x43c   : > { %v1182_v20 = vpop.xlane.xlu1 %1181 }
 0x43d   : > { %v1183_v48 = vmul.f32 %v1182_v20, %v2096_v8  ;;  %v1665_v8 = vld [vmem:[%s2454_s8] ss:$0 sm:$0xff] }
 0x43f   : > { %v1184_v16 = vadd.f32 1e-05, %v1183_v48 }
 0x441   : > { %1705 = vrsqrt.f32 %v1184_v16  ;;  %vm1191_vm15 = vweird.f32 %v1184_v16 }
 0x447   : > { %v1706_v53 = vpop.eup %1705 }
 0x448   : > { %v1186_v54 = vmul.f32 %v1706_v53, %v1184_v16  ;;  %vm1192_vm13 = vweird.f32 %v1706_v53 }
 0x449   : > { %vm1193_vm1 = vmor %vm1191_vm15, %vm1192_vm13 }
 0x44a   : > { %v1187_v55 = vmul.f32 %v1706_v53, %v1186_v54 }
 0x44c   : > { %v1188_v56 = vmul.f32 0.5, %v1187_v55 }
 0x44e   : > { %v1189_v57 = vsub.f32 1.5, %v1188_v56 }
 0x450   : > { %v1190_v46 = vmul.f32 %v1706_v53, %v1189_v57 }
 0x452   : > { %v1194_v59 = vsel %vm1193_vm1, %v1706_v53, %v1190_v46 }
 0x453   : > { %v1195_v62 = vmul.f32 %v1194_v59, %v1178_v41 }
 0x455   : > { %v1199_v39 = vmul.f32 %v1665_v8, %v1195_v62 }
 0x457   : > { %v1203_v2 = vadd.f32 %v1666_v35, %v1199_v39 }
 0x459   : > { %v1204_v3 = vpack.c.bf16 %v1203_v2, %v1203_v2 }
 0x45b   : > { %1516 = vmatmul.msk.bf16.vlgmr.msra.gmra.mxu1 %vm559_vm0, %v1204_v3 }
 0x4d8   : > { %v1237_v63 = vpop.f32.mrf.mxu1 }
 0x4d9   : > { %v1238_v10 = vadd.f32 %v1667_v22, %v1237_v63 }
 0x4db   : > { %v1242_v11 = vmul.f32 0.044715, %v1238_v10  ;;  %v1241_v5 = vmul.f32 0.5, %v1238_v10 }
 0x4dd   : > { %v1243_v13 = vmul.f32 %v1242_v11, %v1238_v10 }
 0x4df   : > { %v1244_v44 = vmul.f32 %v1243_v13, %v1238_v10 }
 0x4e0   : > { %v1239_v14 = vpop.f32.mrf.mxu1 }
 0x4e1   : > { %v1245_v27 = vadd.f32 %v1244_v44, %v1238_v10 }
 0x4e3   : > { %v1246_v49 = vmul.f32 0.7978846, %v1245_v27 }
 0x4e5   : > { %1707 = vtanh.f32 %v1246_v49 }
 0x4eb   : > { %v1708_v15 = vpop.eup %1707 }
 0x4ec   : > { %v1248_v51 = vadd.f32 1.0, %v1708_v15 }
 0x4ee   : > { %v1249_v17 = vmul.f32 %v1248_v51, %v1241_v5 }
 0x4f0   : > { %v1250_v21 = vpack.c.bf16 %v1249_v17, %v1249_v17 }
 0x4f2   : > { %1327 = vmatmul.bf16.vlgmr.msrb.gmra.mxu2 %v1250_v21 }
 0x575   : > { %v1328_v25 = vpop.f32.mrf.mxu2 }
 0x576   : > { %v1329_v26 = vadd.f32 %v1668_v24, %v1328_v25 }
 0x578   : > { %v1332_v12 = vadd.f32 %v1329_v26, %v2367_v37 }
 0x57a   : > { %1333 = vst.msk [vmem:[%s550_s29] sm:$0xff] %vm559_vm0, %v1332_v12 }
 0x57b   : > { %1856 = shalt.err (!%p1853_p8)
}
 0x57c   : > { %1595 = dma.vmem_to_hbm [thread:$0]  (%p2030_p5), %s1348_s30, 128, %s1350_s16, %s1335_s22  }
 0x57d   : > { %v1330_v28 = vpop.f32.mrf.mxu2 }
 0x57e PF: > { %s2508_s20 = sld [smem:[#allocation18_spill]] }
 0x57f   : > { %s2509_s13 = sld [smem:[#allocation16_spill]] }
 0x584   : > { %p1622_p9 = scmp.ge.s32.totalorder %s2508_s20, 2 }
 0x585   : > { %s1361_s18 = sand.u32 1, %s2509_s13  }
 0x586   : > { %p1611_p10 = pnand %p1622_p9, %p2034_p6  ;;  %s1362_s28 = scalar_lea.sflag [#allocation5], %s1361_s18 }
 0x588   : > { %p1612_p11 = pneg %p1611_p10 }
 0x58a   : > { %1886 = dma.done.wait (%p1612_p11), %s1362_s28, 128  }
 0x58b   : > { %1888 = vsyncadd (%p1612_p11), %s1362_s28, 4294967168  ;;  %s2511_s21 = sld [smem:[#allocation19_spill]]  ;;  %s2514_s18 = smov %s1895_s19 }
 0x58c   : > { %s2512_s29 = sld [smem:[#allocation17_spill]] }
 0x58d   : > { %s2513_s20 = sld [smem:[#allocation20_spill]] }
 0x591   : > { %p28_p12 = scmp.ge.s32.totalorder %s2511_s21, 4  }
 0x592   : > { %s2515_s19 = smov %s2512_s29 }
 0x593   :  { %30 = sbr.rel (!%p28_p12) target bundleno = 11 (0xb), region = 132 }
 0x598   :  { %1368 = vsyncpa [#allocation4], 1 }
 0x599   :  { %1370 = vsyncpa [#allocation4 + $0x1], 1 }
 0x59a   :  { %1371 = vsyncpa [#allocation7], 1 }
 0x59b   :  { %1372 = vsyncpa [#allocation10], 1 }
 0x59c   :  { %1373 = vsyncpa [#allocation5], 1 }
 0x59d   :  { %1375 = vsyncpa [#allocation5 + $0x1], 1 }

</bundles_post_ra>
